<compile_context>
chip_gen: v5e
topology: v5e:2x2
jax: 0.10.0
libtpu: 0.0.40
codegen_flags: <defaults>
</compile_context>

<pallas_src>
import math
import functools

import jax
import jax.numpy as jnp
from jax import lax
from jax.experimental import pallas as pl
from jax.experimental.pallas import tpu as pltpu

_EPS = 1e-12  # F.normalize default


def _arc_margin_kernel(x_ref, w_ref, o_ref):
    """One tile of output classes: pure weight streaming into the MXU.

    x_ref: (B, K)   L2-normalized features (compute dtype), grid-invariant
    w_ref: (TN, K)  tile of pre-row-normalized weight rows (compute dtype)
    o_ref: (B, TN)  cosine output tile (f32), lane-dense
    """
    # trans-B dot_general: s[b, n] = sum_k x[b, k] * w[n, k]; no materialized
    # transpose, feeds the MXU directly.  (Default MXU precision; the f32
    # stream passes a 1e-4 parity check at K=512 -- for much larger K and
    # strict parity, use an explicit-precision XLA dot instead.)
    o_ref[...] = lax.dot_general(
        x_ref[...], w_ref[...], (((1,), (1,)), ((), ())),
        preferred_element_type=jnp.float32)


@functools.lru_cache(maxsize=1)
def _vmem_cap_bytes():
    """Physical VMEM capacity (per TensorCore), with a conservative fallback."""
    try:
        info = pltpu.get_tpu_info()
        cap = getattr(info, "vmem_capacity_bytes", None)
        if cap:
            return int(cap)
    except Exception:
        pass
    return 64 << 20  # v7x per-TC VMEM: safe lower bound for all generations


def _pick_tile_n(n_classes, k, itemsize, target_bytes=12 << 20, min_steps=4,
                 weight_vmem_budget=None):
    """Largest power-of-two multiple of 256 whose weight slab is ~target_bytes,
    shrunk so (a) the grid keeps >= min_steps steps when the class count allows
    (>= 2 per v7x TensorCore after megacore sharding, so each core still gets
    DMA/compute overlap) and (b) a double-buffered slab fits the VMEM budget."""
    tn = 256
    while tn * 2 * k * itemsize <= target_bytes and tn < 32768:
        tn *= 2
    while tn > 256 and -(-n_classes // tn) < min_steps:
        tn //= 2
    if weight_vmem_budget is not None:
        while tn > 256 and 2 * tn * k * itemsize > weight_vmem_budget:
            tn //= 2
    return tn


def prepare_arc_margin_weight(weight, *, compute_dtype=jnp.bfloat16, tn=None,
                              target_bytes=12 << 20):
    """One-time weight preparation -- cache the result across calls.

    Row-normalizes the weight in f32 (this subsumes the in-kernel renorm /
    inv_wn input), casts to the streaming dtype and zero-pads the class dim to
    a tile multiple, so each call reads exactly itemsize bytes/element of
    weight from HBM and the kernel body is a single MXU dot.

    Returns (prepared_weight [n_pad, K], n_classes, tn).
    """
    n_classes, k = weight.shape
    itemsize = jnp.dtype(compute_dtype).itemsize
    if tn is None:
        tn = _pick_tile_n(n_classes, k, itemsize, target_bytes=target_bytes,
                          weight_vmem_budget=_vmem_cap_bytes() // 2)
    n_pad = tn * (-(-n_classes // tn))

    w32 = weight.astype(jnp.float32)
    wn = w32 / jnp.maximum(
        jnp.sqrt(jnp.sum(w32 * w32, axis=1, keepdims=True)), _EPS)
    wn = wn.astype(compute_dtype)
    if n_pad != n_classes:
        # zero rows -> zero cosines in the padded columns, sliced off later
        wn = jnp.pad(wn, ((0, n_pad - n_classes), (0, 0)))
    return wn, n_classes, tn


@functools.partial(jax.jit, static_argnames=("n_classes", "tn"))
def arc_margin_cosine(features, w_prepared, *, n_classes, tn):
    """cosine = normalize(features) @ normalize(weight).T using a prepared
    (row-normalized, padded, compute-dtype) weight from prepare_arc_margin_weight.

    features:   (B, in_features) float32
    w_prepared: (n_pad, in_features) compute dtype, rows unit-norm
    returns:    (B, n_classes) float32
    """
    B, K = features.shape
    n_pad, K2 = w_prepared.shape
    assert K == K2, "in_features mismatch"
    assert n_pad % tn == 0, "prepared weight not a multiple of the tile"

    compute_dtype = w_prepared.dtype
    itemsize = jnp.dtype(compute_dtype).itemsize

    # Grid-invariant feature normalization hoisted out of the kernel; norm math
    # stays in f32, only the MXU operand is cast to the streaming dtype.
    x32 = features.astype(jnp.float32)
    xn = x32 / jnp.maximum(
        jnp.sqrt(jnp.sum(x32 * x32, axis=1, keepdims=True)), _EPS)
    xn = xn.astype(compute_dtype)

    grid = (n_pad // tn,)

    # Generation-aware VMEM budget: double-buffered weight slab + output tiles
    # + resident features + headroom.  Floor 32 MiB (lifts v5e's 16 MiB scoped
    # default); cap 3/4 of physical VMEM (48 MiB on v7x, ~96 MiB on v5e/v6e).
    need = 2 * tn * K * itemsize + 2 * B * tn * 4 + 2 * B * K * itemsize
    vmem_limit = int(min(max(need + (8 << 20), 32 << 20),
                         (_vmem_cap_bytes() * 3) // 4))

    cost = pl.CostEstimate(
        flops=2 * B * n_pad * K,
        transcendentals=0,
        bytes_accessed=n_pad * K * itemsize + B * K * itemsize + B * n_pad * 4,
    )

    out = pl.pallas_call(
        _arc_margin_kernel,
        out_shape=jax.ShapeDtypeStruct((B, n_pad), jnp.float32),
        grid_spec=pltpu.PrefetchScalarGridSpec(
            num_scalar_prefetch=0,
            grid=grid,
            in_specs=[
                pl.BlockSpec((B, K), lambda j: (0, 0)),    # features, resident
                pl.BlockSpec((tn, K), lambda j: (j, 0)),   # stream weight rows
            ],
            out_specs=pl.BlockSpec((B, tn), lambda j: (0, j)),
        ),
        compiler_params=pltpu.CompilerParams(
            dimension_semantics=("parallel",),
            vmem_limit_bytes=vmem_limit,
        ),
        cost_estimate=cost,
    )(xn, w_prepared)

    return out[:, :n_classes] if n_pad != n_classes else out


if __name__ == "__main__":
    B = 8                 # small batch
    in_features = 512     # ArcFace_9layers feature dim (matches the module)
    classes_num = 2048    # small classifier head -> tn=512, 4 weight tiles

    key = jax.random.PRNGKey(0)
    k_feat, k_w = jax.random.split(key)

    features = jax.random.normal(k_feat, (B, in_features), dtype=jnp.float32)

    # Deterministic init matching reset_parameters():
    # uniform(-stdv, stdv) with stdv = 1/sqrt(in_features)
    stdv = 1.0 / math.sqrt(in_features)
    weight = jax.random.uniform(
        k_w, (classes_num, in_features), dtype=jnp.float32,
        minval=-stdv, maxval=stdv)

    # Plain-JAX reference with exact F.normalize + F.linear semantics.
    xn_ref = features / jnp.maximum(
        jnp.linalg.norm(features, axis=1, keepdims=True), _EPS)
    wn_ref = weight / jnp.maximum(
        jnp.linalg.norm(weight, axis=1, keepdims=True), _EPS)
    ref = lax.dot_general(xn_ref, wn_ref, (((1,), (1,)), ((), ())),
                          precision=lax.Precision.HIGHEST)

    # 1) f32 weight-streaming path (exact-parity check)
    w_f32, n_cls, tn_f32 = prepare_arc_margin_weight(
        weight, compute_dtype=jnp.float32)
    cos_f32 = jax.block_until_ready(
        arc_margin_cosine(features, w_f32, n_classes=n_cls, tn=tn_f32))
    assert cos_f32.shape == (B, classes_num)
    err_f32 = float(jnp.max(jnp.abs(cos_f32 - ref)))
    assert err_f32 < 1e-4, f"f32 path error too large: {err_f32}"

    # 2) default bf16 weight-streaming path (weight prepared once, reused)
    w_bf16, n_cls, tn_bf16 = prepare_arc_margin_weight(weight)
    cos_bf16 = jax.block_until_ready(
        arc_margin_cosine(features, w_bf16, n_classes=n_cls, tn=tn_bf16))
    assert cos_bf16.shape == (B, classes_num)
    err_bf16 = float(jnp.max(jnp.abs(cos_bf16 - ref)))
    assert err_bf16 < 2e-2, f"bf16 path error too large: {err_bf16}"

    print("KERNEL_OK")
</pallas_src>

<mosaic_0001>
module attributes {stable_mosaic.version = 11 : i64} {
  func.func @_arc_margin_kernel(%arg0: i32, %arg1: memref<8x512xf32, #tpu.memory_space<vmem>>, %arg2: memref<512x512xf32, #tpu.memory_space<vmem>>, %arg3: memref<8x512xf32, #tpu.memory_space<vmem>>) attributes {dimension_semantics = [#tpu.dimension_semantics<parallel>], iteration_bounds = array<i64: 4>, scalar_prefetch = 0 : i64, scratch_operands = 0 : i64, tpu.core_type = #tpu.core_type<tc>, window_params = [{pipeline_mode = #tpu.pipeline_mode<synchronous>, transform_indices = @transform_0, window_bounds = array<i64: 8, 512>}, {transform_indices = @transform_1, window_bounds = array<i64: 512, 512>}, {transform_indices = @transform_2, window_bounds = array<i64: 8, 512>}]} {
    %c0 = arith.constant 0 : index
    %c0_0 = arith.constant 0 : index
    %0 = vector.load %arg1[%c0, %c0_0] : memref<8x512xf32, #tpu.memory_space<vmem>>, vector<8x512xf32>
    %c0_1 = arith.constant 0 : index
    %c0_2 = arith.constant 0 : index
    %1 = vector.load %arg2[%c0_1, %c0_2] : memref<512x512xf32, #tpu.memory_space<vmem>>, vector<512x512xf32>
    %cst = arith.constant dense<0.000000e+00> : vector<8x512xf32>
    %2 = tpu.matmul %0, %1, %cst {dimension_numbers = #tpu.dot_dimension_numbers<[1], [1], [0], [0], [0, 0, 1, 0], [], []>} : vector<8x512xf32>, vector<512x512xf32>, vector<8x512xf32> -> vector<8x512xf32>
    %c0_3 = arith.constant 0 : index
    %c0_4 = arith.constant 0 : index
    %3 = vector.load %arg3[%c0_3, %c0_4] : memref<8x512xf32, #tpu.memory_space<vmem>>, vector<8x512xf32>
    tpu.vector_store %arg3[%c0_3, %c0_4], %2 {strides = array<i32>} : memref<8x512xf32, #tpu.memory_space<vmem>>, vector<8x512xf32>,
    return
  }
  func.func @transform_0(%arg0: i32) -> (i32, i32) {
    %c0_i32 = arith.constant 0 : i32
    %c0_i32_0 = arith.constant 0 : i32
    %c0_i32_1 = arith.constant 0 : i32
    return %c0_i32, %c0_i32_0 : i32, i32
  }
  func.func @transform_1(%arg0: i32) -> (i32, i32) {
    %c0_i32 = arith.constant 0 : i32
    %c0_i32_0 = arith.constant 0 : i32
    return %arg0, %c0_i32 : i32, i32
  }
  func.func @transform_2(%arg0: i32) -> (i32, i32) {
    %c0_i32 = arith.constant 0 : i32
    %c0_i32_0 = arith.constant 0 : i32
    return %c0_i32, %arg0 : i32, i32
  }
}

</mosaic_0001>

<bundles_post_ra>
// kernel: arc_margin_cosine.1
= control target key start
LH: loop header
LB: loop body
LE: loop exit
PB: predicated region body
PF: predicated region fallthrough
CT: control target
= control target key end

     0   :  { %7 = vsyncpa [#allocation3], 0  ;;  %s1446_s0 = inlined_call_operand.vmem [shape: f32[8,512], index: 0, kind: input, shape index: {}]   ;;  %s1447_s1 = inlined_call_operand.hbm [shape: f32[2048,512], index: 1, kind: input, shape index: {}]   ;;  %s1448_s2 = inlined_call_operand.hbm [shape: f32[8,2048], index: 2, kind: output, shape index: {}]  }
   0x1   :  { %9 = vsyncpa [#allocation3 + $0x1], 0 }
   0x2   :  { %10 = vsyncpa [#allocation4], 0 }
   0x3   :  { %12 = vsyncpa [#allocation4 + $0x1], 0  ;;  %s1019_s9 = smov 0   ;;  %s1021_s10 = smov 0  }
   0x4   :  { %s1023_s11 = smov 0   ;;  %s1025_s12 = smov 0  }
   0x5 LB: > { %s1040_s13 = sadd.s32 4294967295, %s1000_s12   ;;  %s838_s14 = sadd.s32 4294967294, %s1000_s12   ;;  %s1000_s12 = sphi %s1025_s12, %s1457_s12   ;;  %s996_s11 = sphi %s1023_s11, %s1456_s11   ;;  %s992_s10 = sphi %s1021_s10, %s1455_s10   ;;  %s988_s9 = sphi %s1019_s9, %s1454_s9  }
   0x6   : > { %s1044_s15 = sadd.s32 1, %s1000_s12   ;;  %s46_s16 = sadd.s32 1, %s996_s11 }
   0x7   : > { %s43_s17 = ssub.s32 %s1000_s12, %s1044_s15  ;;  %p53_p0 = scmp.ne.s32.totalorder %s996_s11, %s992_s10 }
   0x8   : > { %p44_p1 = scmp.eq.s32.totalorder %s43_s17, 0  ;;  %p54_p2 = scmp.eq.s32.totalorder %s1000_s12, 0 }
   0x9   : > { %p59_p3 = scmp.ne.s32.totalorder %s992_s10, %s988_s9  ;;  %p60_p4 = scmp.eq.s32.totalorder %s1040_s13, 0 }
   0xa   : > { %s1056_s18 = scalar_select %p44_p1, %s996_s11, %s46_s16  }
   0xb   : > { %p1058_p5 = por %p54_p2, %p53_p0  ;;  %p1062_p6 = por %p60_p4, %p59_p3 }
   0xc   : > { %p83_p7 = scmp.eq.s32.totalorder %s1040_s13, 3  ;;  %p89_p8 = scmp.eq.s32.totalorder %s838_s14, 3 }
   0xd   : > { %p868_p9 = scmp.lt.s32.totalorder %s1000_s12, 4  ;;  %s112_s23 = sand.u32 1, %s996_s11  }
   0xe   : > { %p1068_p10 = por %p83_p7, %p53_p0  ;;  %p1072_p11 = por %p89_p8, %p59_p3 }
   0xf   : > { %s854_s24 = sshll.u32 %s1000_s12, 11  ;;  %s841_s25 = sshll.u32 %s112_s23, 11 }
  0x10   : > { %s122_s28 = scalar_lea.hbm %s1447_s1, %s854_s24  ;;  %s116_s30 = scalar_lea.vmem [#allocation2], %s841_s25 }
  0x11   : > { %s123_s29 = sshll.u32 %s122_s28, 4  ;;  %s125_s3 = sshll.u32 %s116_s30, 4  ;;  %s124_s29 = int_to_ptr.hbm [resolvable:$true] %s123_s29  ;;  %s126_s3 = int_to_ptr.vmem [resolvable:$true] %s125_s3 }
  0x12   : > { %p1083_p12 = pnand %p868_p9, %p1058_p5  ;;  %p845_p13 = scmp.ge.s32.totalorder %s1000_s12, 1 }
  0x13   : > { %p133_p0 = scmp.lt.s32.totalorder %s1000_s12, 5  ;;  %s113_s5 = scalar_lea.sflag [#allocation3], %s112_s23 }
  0x14   : > { %s904_s6 = sshra.s32 %s124_s29, 4  ;;  %p908_p2 = pneg %p1083_p12  ;;  %s905_s6 = int_to_ptr.hbm [resolvable:$true] %s904_s6 }
  0x15   : > { %s906_s7 = scalar_lea.hbm %s905_s6, 2048  ;;  %s911_s16 = scalar_lea.hbm %s1447_s1, 8192 }
  0x16   : > { %p907_p1 = scmp.ne.s32.totalorder %s905_s6, %s906_s7  ;;  %p912_p5 = scmp.lt.s32.totalorder %s905_s6, %s1447_s1 }
  0x17   : > { %p913_p7 = scmp.lt.s32.totalorder %s911_s16, %s906_s7 }
  0x18   : > { %p909_p3 = pnand %p908_p2, %p907_p1 }
  0x19   : > { %p914_p8 = por %p913_p7, %p912_p5 }
  0x1a   : > { %p910_p4 = pneg %p909_p3 }
  0x1c   : > { %p915_p9 = pnand %p914_p8, %p910_p4 }
  0x1e   : > { %918 = shalt.err (!%p915_p9)
}
  0x1f   : > { %s1002_s23 = smov 512   ;;  %s1003_s24 = smov 32  }
  0x20   : > { %863 = dma.hbm_to_vmem [thread:$0]  (!%p1083_p12), %s124_s29, 32768, %s126_s3, %s113_s5, %s1002_s23, %s1002_s23, %s1003_s24  }
  0x21   : > { %p134_p1 = pnand %p845_p13, %p133_p0 }
  0x22   : > { %s1104_s25 = sand.u32 (!%p134_p1), 1, %s992_s10  }
  0x23   : > { %137 = sbr.rel (%p134_p1) target bundleno = 436 (0x1b4), region = 28  ;;  %s846_s26 = sshll.u32 (!%p134_p1), %s1104_s25, 11 }
  0x24   : > { %s140_s27 = scalar_lea.sflag (!%p134_p1), [#allocation3], %s1104_s25  ;;  %s1108_s28 = scalar_lea.vmem (!%p134_p1), [#allocation2], %s846_s26 }
  0x28   : > { %979 = dma.done.wait (%p1062_p6), %s140_s27, 32768  }
  0x29   : > { %981 = vsyncadd (%p1062_p6), %s140_s27, 4294934528  ;;  %v233_v0 = vld [vmem:[%s1108_s28 + $0x1f0] sm:$0xff]  ;;  %v234_v1 = vld [vmem:[%s1108_s28 + $0x1f8] sm:$0xff]  ;;  %s847_s8 = sshll.u32 %s1104_s25, 5  ;;  %s855_s16 = sshll.u32 %s1040_s13, 5 }
  0x2a   : > { %v231_v2 = vld [vmem:[%s1108_s28 + $0x1e0] sm:$0xff]  ;;  %467 = vmatpush.xpose.msra.mxu2 %v233_v0  ;;  %487 = vmatpush.xpose.msra.mxu3 %v234_v1  ;;  %v232_v3 = vld [vmem:[%s1108_s28 + $0x1e8] sm:$0xff]  ;;  %v229_v4 = vld [vmem:[%s1108_s28 + $0x1d0] sm:$0xff]  ;;  %s1387_s14 = scalar_lea.vmem [#allocation5], %s847_s8  ;;  %s763_s23 = scalar_lea.hbm %s1448_s2, %s855_s16 }
  0x2b   : > { %427 = vmatpush.xpose.msra.mxu0 %v231_v2  ;;  %447 = vmatpush.xpose.msra.mxu1 %v232_v3  ;;  %v230_v5 = vld [vmem:[%s1108_s28 + $0x1d8] sm:$0xff]  ;;  %v227_v6 = vld [vmem:[%s1108_s28 + $0x1c0] sm:$0xff]  ;;  %v228_v7 = vld [vmem:[%s1108_s28 + $0x1c8] sm:$0xff]  ;;  %s765_s24 = sshll.u32 %s1387_s14, 4  ;;  %s767_s26 = sshll.u32 %s763_s23, 4  ;;  %s766_s24 = int_to_ptr.vmem [resolvable:$true] %s765_s24  ;;  %s768_s26 = int_to_ptr.hbm [resolvable:$true] %s767_s26 }
  0x2c   : > { %v225_v8 = vld [vmem:[%s1108_s28 + $0x1b0] sm:$0xff]  ;;  %v226_v9 = vld [vmem:[%s1108_s28 + $0x1b8] sm:$0xff]  ;;  %v223_v10 = vld [vmem:[%s1108_s28 + $0x1a0] sm:$0xff]  ;;  %s752_s27 = scalar_lea.sflag [#allocation4], %s1104_s25  ;;  %s954_s30 = scalar_lea.hbm %s1448_s2, 128 }
  0x2d   : > { %v224_v11 = vld [vmem:[%s1108_s28 + $0x1a8] sm:$0xff]  ;;  %v221_v12 = vld [vmem:[%s1108_s28 + $0x190] sm:$0xff]  ;;  %v222_v13 = vld [vmem:[%s1108_s28 + $0x198] sm:$0xff] }
  0x2e   : > { %468 = vmatpush.xpose.msra.mxu2 %v229_v4  ;;  %488 = vmatpush.xpose.msra.mxu3 %v230_v5  ;;  %v219_v14 = vld [vmem:[%s1108_s28 + $0x180] sm:$0xff]  ;;  %v220_v15 = vld [vmem:[%s1108_s28 + $0x188] sm:$0xff]  ;;  %v217_v16 = vld [vmem:[%s1108_s28 + $0x170] sm:$0xff] }
  0x2f   : > { %428 = vmatpush.xpose.msra.mxu0 %v227_v6  ;;  %448 = vmatpush.xpose.msra.mxu1 %v228_v7  ;;  %v218_v17 = vld [vmem:[%s1108_s28 + $0x178] sm:$0xff]  ;;  %v215_v18 = vld [vmem:[%s1108_s28 + $0x160] sm:$0xff]  ;;  %v216_v19 = vld [vmem:[%s1108_s28 + $0x168] sm:$0xff] }
  0x30   : > { %v213_v20 = vld [vmem:[%s1108_s28 + $0x150] sm:$0xff]  ;;  %v214_v21 = vld [vmem:[%s1108_s28 + $0x158] sm:$0xff]  ;;  %v211_v22 = vld [vmem:[%s1108_s28 + $0x140] sm:$0xff] }
  0x31   : > { %v212_v23 = vld [vmem:[%s1108_s28 + $0x148] sm:$0xff]  ;;  %v209_v24 = vld [vmem:[%s1108_s28 + $0x130] sm:$0xff]  ;;  %v210_v25 = vld [vmem:[%s1108_s28 + $0x138] sm:$0xff] }
  0x32   : > { %469 = vmatpush.xpose.msra.mxu2 %v225_v8  ;;  %489 = vmatpush.xpose.msra.mxu3 %v226_v9  ;;  %v207_v26 = vld [vmem:[%s1108_s28 + $0x120] sm:$0xff]  ;;  %v208_v27 = vld [vmem:[%s1108_s28 + $0x128] sm:$0xff]  ;;  %v205_v28 = vld [vmem:[%s1108_s28 + $0x110] sm:$0xff] }
  0x33   : > { %429 = vmatpush.xpose.msra.mxu0 %v223_v10  ;;  %449 = vmatpush.xpose.msra.mxu1 %v224_v11  ;;  %v206_v29 = vld [vmem:[%s1108_s28 + $0x118] sm:$0xff]  ;;  %v203_v30 = vld [vmem:[%s1108_s28 + $0x100] sm:$0xff]  ;;  %v204_v31 = vld [vmem:[%s1108_s28 + $0x108] sm:$0xff] }
  0x34   : > { %v201_v32 = vld [vmem:[%s1108_s28 + $0xf0] sm:$0xff]  ;;  %v202_v33 = vld [vmem:[%s1108_s28 + $0xf8] sm:$0xff]  ;;  %v199_v34 = vld [vmem:[%s1108_s28 + $0xe0] sm:$0xff] }
  0x35   : > { %v200_v35 = vld [vmem:[%s1108_s28 + $0xe8] sm:$0xff]  ;;  %v197_v36 = vld [vmem:[%s1108_s28 + $0xd0] sm:$0xff]  ;;  %v198_v37 = vld [vmem:[%s1108_s28 + $0xd8] sm:$0xff] }
  0x36   : > { %470 = vmatpush.xpose.msra.mxu2 %v221_v12  ;;  %490 = vmatpush.xpose.msra.mxu3 %v222_v13  ;;  %v195_v38 = vld [vmem:[%s1108_s28 + $0xc0] sm:$0xff]  ;;  %v196_v39 = vld [vmem:[%s1108_s28 + $0xc8] sm:$0xff]  ;;  %v193_v40 = vld [vmem:[%s1108_s28 + $0xb0] sm:$0xff] }
  0x37   : > { %430 = vmatpush.xpose.msra.mxu0 %v219_v14  ;;  %450 = vmatpush.xpose.msra.mxu1 %v220_v15  ;;  %v194_v41 = vld [vmem:[%s1108_s28 + $0xb8] sm:$0xff]  ;;  %v191_v42 = vld [vmem:[%s1108_s28 + $0xa0] sm:$0xff]  ;;  %v192_v43 = vld [vmem:[%s1108_s28 + $0xa8] sm:$0xff] }
  0x38   : > { %v189_v44 = vld [vmem:[%s1108_s28 + $0x90] sm:$0xff]  ;;  %v190_v45 = vld [vmem:[%s1108_s28 + $0x98] sm:$0xff]  ;;  %v187_v46 = vld [vmem:[%s1108_s28 + $0x80] sm:$0xff] }
  0x39   : > { %v188_v47 = vld [vmem:[%s1108_s28 + $0x88] sm:$0xff]  ;;  %v185_v48 = vld [vmem:[%s1108_s28 + $0x70] sm:$0xff]  ;;  %v186_v49 = vld [vmem:[%s1108_s28 + $0x78] sm:$0xff] }
  0x3a   : > { %471 = vmatpush.xpose.msra.mxu2 %v217_v16  ;;  %491 = vmatpush.xpose.msra.mxu3 %v218_v17  ;;  %v183_v50 = vld [vmem:[%s1108_s28 + $0x60] sm:$0xff]  ;;  %v184_v51 = vld [vmem:[%s1108_s28 + $0x68] sm:$0xff]  ;;  %v181_v52 = vld [vmem:[%s1108_s28 + $0x50] sm:$0xff] }
  0x3b   : > { %431 = vmatpush.xpose.msra.mxu0 %v215_v18  ;;  %451 = vmatpush.xpose.msra.mxu1 %v216_v19  ;;  %v182_v53 = vld [vmem:[%s1108_s28 + $0x58] sm:$0xff]  ;;  %v179_v54 = vld [vmem:[%s1108_s28 + $0x40] sm:$0xff]  ;;  %v180_v55 = vld [vmem:[%s1108_s28 + $0x48] sm:$0xff] }
  0x3c   : > { %v177_v56 = vld [vmem:[%s1108_s28 + $0x30] sm:$0xff]  ;;  %v178_v57 = vld [vmem:[%s1108_s28 + $0x38] sm:$0xff]  ;;  %v175_v58 = vld [vmem:[%s1108_s28 + $0x20] sm:$0xff] }
  0x3d   : > { %v176_v59 = vld [vmem:[%s1108_s28 + $0x28] sm:$0xff]  ;;  %v173_v60 = vld [vmem:[%s1108_s28 + $0x10] sm:$0xff]  ;;  %v174_v61 = vld [vmem:[%s1108_s28 + $0x18] sm:$0xff] }
  0x3e   : > { %472 = vmatpush.xpose.msra.mxu2 %v213_v20  ;;  %492 = vmatpush.xpose.msra.mxu3 %v214_v21  ;;  %v297_v62 = vld [vmem:[%s1108_s28 + $0x3f0] sm:$0xff]  ;;  %v298_v63 = vld [vmem:[%s1108_s28 + $0x3f8] sm:$0xff]  ;;  %v171_v0 = vld [vmem:[%s1108_s28] sm:$0xff] }
  0x3f   : > { %432 = vmatpush.xpose.msra.mxu0 %v211_v22  ;;  %452 = vmatpush.xpose.msra.mxu1 %v212_v23  ;;  %v172_v1 = vld [vmem:[%s1108_s28 + $0x8] sm:$0xff]  ;;  %v295_v2 = vld [vmem:[%s1108_s28 + $0x3e0] sm:$0xff]  ;;  %v293_v4 = vld [vmem:[%s1108_s28 + $0x3d0] sm:$0xff] }
  0x40   : > { %v296_v3 = vld [vmem:[%s1108_s28 + $0x3e8] sm:$0xff]  ;;  %v294_v5 = vld [vmem:[%s1108_s28 + $0x3d8] sm:$0xff]  ;;  %v291_v6 = vld [vmem:[%s1108_s28 + $0x3c0] sm:$0xff] }
  0x41   : > { %v292_v7 = vld [vmem:[%s1108_s28 + $0x3c8] sm:$0xff]  ;;  %v289_v8 = vld [vmem:[%s1108_s28 + $0x3b0] sm:$0xff]  ;;  %v290_v9 = vld [vmem:[%s1108_s28 + $0x3b8] sm:$0xff] }
  0x42   : > { %473 = vmatpush.xpose.msra.mxu2 %v209_v24  ;;  %493 = vmatpush.xpose.msra.mxu3 %v210_v25  ;;  %v287_v10 = vld [vmem:[%s1108_s28 + $0x3a0] sm:$0xff]  ;;  %v288_v11 = vld [vmem:[%s1108_s28 + $0x3a8] sm:$0xff]  ;;  %v285_v12 = vld [vmem:[%s1108_s28 + $0x390] sm:$0xff] }
  0x43   : > { %433 = vmatpush.xpose.msra.mxu0 %v207_v26  ;;  %453 = vmatpush.xpose.msra.mxu1 %v208_v27  ;;  %v286_v13 = vld [vmem:[%s1108_s28 + $0x398] sm:$0xff]  ;;  %v283_v14 = vld [vmem:[%s1108_s28 + $0x380] sm:$0xff]  ;;  %v284_v15 = vld [vmem:[%s1108_s28 + $0x388] sm:$0xff] }
  0x44   : > { %v281_v16 = vld [vmem:[%s1108_s28 + $0x370] sm:$0xff]  ;;  %v282_v17 = vld [vmem:[%s1108_s28 + $0x378] sm:$0xff]  ;;  %v279_v18 = vld [vmem:[%s1108_s28 + $0x360] sm:$0xff] }
  0x45   : > { %v280_v19 = vld [vmem:[%s1108_s28 + $0x368] sm:$0xff]  ;;  %v277_v20 = vld [vmem:[%s1108_s28 + $0x350] sm:$0xff]  ;;  %v278_v21 = vld [vmem:[%s1108_s28 + $0x358] sm:$0xff] }
  0x46   : > { %474 = vmatpush.xpose.msra.mxu2 %v205_v28  ;;  %494 = vmatpush.xpose.msra.mxu3 %v206_v29  ;;  %v275_v22 = vld [vmem:[%s1108_s28 + $0x340] sm:$0xff]  ;;  %v276_v23 = vld [vmem:[%s1108_s28 + $0x348] sm:$0xff]  ;;  %v273_v24 = vld [vmem:[%s1108_s28 + $0x330] sm:$0xff] }
  0x47   : > { %434 = vmatpush.xpose.msra.mxu0 %v203_v30  ;;  %454 = vmatpush.xpose.msra.mxu1 %v204_v31  ;;  %v274_v25 = vld [vmem:[%s1108_s28 + $0x338] sm:$0xff]  ;;  %v271_v26 = vld [vmem:[%s1108_s28 + $0x320] sm:$0xff]  ;;  %v272_v27 = vld [vmem:[%s1108_s28 + $0x328] sm:$0xff] }
  0x48   : > { %v269_v28 = vld [vmem:[%s1108_s28 + $0x310] sm:$0xff]  ;;  %v270_v29 = vld [vmem:[%s1108_s28 + $0x318] sm:$0xff]  ;;  %v267_v30 = vld [vmem:[%s1108_s28 + $0x300] sm:$0xff] }
  0x49   : > { %v268_v31 = vld [vmem:[%s1108_s28 + $0x308] sm:$0xff] }
  0x4a   : > { %475 = vmatpush.xpose.msra.mxu2 %v201_v32  ;;  %495 = vmatpush.xpose.msra.mxu3 %v202_v33  ;;  %v1213_v32 = vld [vmem:[%s1446_s0 + $0x10] sm:$0xff] }
  0x4b   : > { %435 = vmatpush.xpose.msra.mxu0 %v199_v34  ;;  %455 = vmatpush.xpose.msra.mxu1 %v200_v35  ;;  %v265_v33 = vld [vmem:[%s1108_s28 + $0x2f0] sm:$0xff]  ;;  %v266_v34 = vld [vmem:[%s1108_s28 + $0x2f8] sm:$0xff] }
  0x4c   : > { %v1221_v35 = vld [vmem:[%s1446_s0 + $0x18] sm:$0xff] }
  0x4e   : > { %476 = vmatpush.xpose.msra.mxu2 %v197_v36  ;;  %496 = vmatpush.xpose.msra.mxu3 %v198_v37  ;;  %v1226_v36 = vld [vmem:[%s1446_s0] sm:$0xff] }
  0x4f   : > { %436 = vmatpush.xpose.msra.mxu0 %v195_v38  ;;  %456 = vmatpush.xpose.msra.mxu1 %v196_v39  ;;  %v263_v37 = vld [vmem:[%s1108_s28 + $0x2e0] sm:$0xff]  ;;  %v264_v38 = vld [vmem:[%s1108_s28 + $0x2e8] sm:$0xff] }
  0x50   : > { %v1235_v39 = vld [vmem:[%s1446_s0 + $0x8] sm:$0xff] }
  0x52   : > { %477 = vmatpush.xpose.msra.mxu2 %v193_v40  ;;  %497 = vmatpush.xpose.msra.mxu3 %v194_v41  ;;  %v261_v40 = vld [vmem:[%s1108_s28 + $0x2d0] sm:$0xff]  ;;  %v262_v41 = vld [vmem:[%s1108_s28 + $0x2d8] sm:$0xff] }
  0x53   : > { %437 = vmatpush.xpose.msra.mxu0 %v191_v42  ;;  %457 = vmatpush.xpose.msra.mxu1 %v192_v43  ;;  %v259_v42 = vld [vmem:[%s1108_s28 + $0x2c0] sm:$0xff]  ;;  %v260_v43 = vld [vmem:[%s1108_s28 + $0x2c8] sm:$0xff] }
  0x56   : > { %478 = vmatpush.xpose.msra.mxu2 %v189_v44  ;;  %498 = vmatpush.xpose.msra.mxu3 %v190_v45  ;;  %v257_v44 = vld [vmem:[%s1108_s28 + $0x2b0] sm:$0xff]  ;;  %v258_v45 = vld [vmem:[%s1108_s28 + $0x2b8] sm:$0xff] }
  0x57   : > { %438 = vmatpush.xpose.msra.mxu0 %v187_v46  ;;  %458 = vmatpush.xpose.msra.mxu1 %v188_v47  ;;  %v255_v46 = vld [vmem:[%s1108_s28 + $0x2a0] sm:$0xff]  ;;  %v256_v47 = vld [vmem:[%s1108_s28 + $0x2a8] sm:$0xff] }
  0x5a   : > { %479 = vmatpush.xpose.msra.mxu2 %v185_v48  ;;  %499 = vmatpush.xpose.msra.mxu3 %v186_v49  ;;  %v253_v48 = vld [vmem:[%s1108_s28 + $0x290] sm:$0xff]  ;;  %v254_v49 = vld [vmem:[%s1108_s28 + $0x298] sm:$0xff] }
  0x5b   : > { %439 = vmatpush.xpose.msra.mxu0 %v183_v50  ;;  %459 = vmatpush.xpose.msra.mxu1 %v184_v51  ;;  %v251_v50 = vld [vmem:[%s1108_s28 + $0x280] sm:$0xff]  ;;  %v252_v51 = vld [vmem:[%s1108_s28 + $0x288] sm:$0xff] }
  0x5e   : > { %480 = vmatpush.xpose.msra.mxu2 %v181_v52  ;;  %500 = vmatpush.xpose.msra.mxu3 %v182_v53  ;;  %v249_v52 = vld [vmem:[%s1108_s28 + $0x270] sm:$0xff]  ;;  %v250_v53 = vld [vmem:[%s1108_s28 + $0x278] sm:$0xff] }
  0x5f   : > { %440 = vmatpush.xpose.msra.mxu0 %v179_v54  ;;  %460 = vmatpush.xpose.msra.mxu1 %v180_v55  ;;  %v247_v54 = vld [vmem:[%s1108_s28 + $0x260] sm:$0xff]  ;;  %v248_v55 = vld [vmem:[%s1108_s28 + $0x268] sm:$0xff] }
  0x62   : > { %481 = vmatpush.xpose.msra.mxu2 %v177_v56  ;;  %501 = vmatpush.xpose.msra.mxu3 %v178_v57  ;;  %v245_v56 = vld [vmem:[%s1108_s28 + $0x250] sm:$0xff]  ;;  %v246_v57 = vld [vmem:[%s1108_s28 + $0x258] sm:$0xff] }
  0x63   : > { %441 = vmatpush.xpose.msra.mxu0 %v175_v58  ;;  %461 = vmatpush.xpose.msra.mxu1 %v176_v59  ;;  %v243_v58 = vld [vmem:[%s1108_s28 + $0x240] sm:$0xff]  ;;  %v244_v59 = vld [vmem:[%s1108_s28 + $0x248] sm:$0xff] }
  0x66   : > { %482 = vmatpush.xpose.msra.mxu2 %v173_v60  ;;  %502 = vmatpush.xpose.msra.mxu3 %v174_v61  ;;  %v241_v60 = vld [vmem:[%s1108_s28 + $0x230] sm:$0xff]  ;;  %v242_v61 = vld [vmem:[%s1108_s28 + $0x238] sm:$0xff] }
  0x67   : > { %442 = vmatpush.xpose.msra.mxu0 %v171_v0  ;;  %462 = vmatpush.xpose.msra.mxu1 %v172_v1  ;;  %v237_v0 = vld [vmem:[%s1108_s28 + $0x210] sm:$0xff]  ;;  %v238_v1 = vld [vmem:[%s1108_s28 + $0x218] sm:$0xff] }
  0x69   : > { %483 = vmatmul.f32.vlgmr.msra.gmra.mxu2 %v1213_v32  ;;  %503 = vmatmul.f32.vlgmr.msra.gmra.mxu3 %v1221_v35 }
  0x6a   : > { %547 = vmatpush.xpose.msrb.mxu2 %v297_v62  ;;  %567 = vmatpush.xpose.msrb.mxu3 %v298_v63  ;;  %v239_v62 = vld [vmem:[%s1108_s28 + $0x220] sm:$0xff]  ;;  %v240_v63 = vld [vmem:[%s1108_s28 + $0x228] sm:$0xff] }
  0x6b   : > { %507 = vmatpush.xpose.msrb.mxu0 %v295_v2  ;;  %527 = vmatpush.xpose.msrb.mxu1 %v296_v3  ;;  %v361_v2 = vld [vmem:[%s1108_s28 + $0x5f0] sm:$0xff]  ;;  %v362_v3 = vld [vmem:[%s1108_s28 + $0x5f8] sm:$0xff] }
  0x6c   : > { %443 = vmatmul.f32.vlgmr.msra.gmra.mxu0 %v1226_v36  ;;  %463 = vmatmul.f32.vlgmr.msra.gmra.mxu1 %v1235_v39 }
  0x6e   : > { %548 = vmatpush.xpose.msrb.mxu2 %v293_v4  ;;  %568 = vmatpush.xpose.msrb.mxu3 %v294_v5  ;;  %v235_v4 = vld [vmem:[%s1108_s28 + $0x200] sm:$0xff]  ;;  %v236_v5 = vld [vmem:[%s1108_s28 + $0x208] sm:$0xff] }
  0x6f   : > { %508 = vmatpush.xpose.msrb.mxu0 %v291_v6  ;;  %528 = vmatpush.xpose.msrb.mxu1 %v292_v7  ;;  %v359_v6 = vld [vmem:[%s1108_s28 + $0x5e0] sm:$0xff]  ;;  %v360_v7 = vld [vmem:[%s1108_s28 + $0x5e8] sm:$0xff] }
  0x72   : > { %549 = vmatpush.xpose.msrb.mxu2 %v289_v8  ;;  %569 = vmatpush.xpose.msrb.mxu3 %v290_v9  ;;  %v357_v8 = vld [vmem:[%s1108_s28 + $0x5d0] sm:$0xff]  ;;  %v358_v9 = vld [vmem:[%s1108_s28 + $0x5d8] sm:$0xff] }
  0x73   : > { %509 = vmatpush.xpose.msrb.mxu0 %v287_v10  ;;  %529 = vmatpush.xpose.msrb.mxu1 %v288_v11  ;;  %v355_v10 = vld [vmem:[%s1108_s28 + $0x5c0] sm:$0xff]  ;;  %v356_v11 = vld [vmem:[%s1108_s28 + $0x5c8] sm:$0xff] }
  0x76   : > { %550 = vmatpush.xpose.msrb.mxu2 %v285_v12  ;;  %570 = vmatpush.xpose.msrb.mxu3 %v286_v13  ;;  %v353_v12 = vld [vmem:[%s1108_s28 + $0x5b0] sm:$0xff]  ;;  %v354_v13 = vld [vmem:[%s1108_s28 + $0x5b8] sm:$0xff] }
  0x77   : > { %510 = vmatpush.xpose.msrb.mxu0 %v283_v14  ;;  %530 = vmatpush.xpose.msrb.mxu1 %v284_v15  ;;  %v351_v14 = vld [vmem:[%s1108_s28 + $0x5a0] sm:$0xff]  ;;  %v352_v15 = vld [vmem:[%s1108_s28 + $0x5a8] sm:$0xff] }
  0x7a   : > { %551 = vmatpush.xpose.msrb.mxu2 %v281_v16  ;;  %571 = vmatpush.xpose.msrb.mxu3 %v282_v17  ;;  %v349_v16 = vld [vmem:[%s1108_s28 + $0x590] sm:$0xff]  ;;  %v350_v17 = vld [vmem:[%s1108_s28 + $0x598] sm:$0xff] }
  0x7b   : > { %511 = vmatpush.xpose.msrb.mxu0 %v279_v18  ;;  %531 = vmatpush.xpose.msrb.mxu1 %v280_v19  ;;  %v347_v18 = vld [vmem:[%s1108_s28 + $0x580] sm:$0xff]  ;;  %v348_v19 = vld [vmem:[%s1108_s28 + $0x588] sm:$0xff] }
  0x7e   : > { %552 = vmatpush.xpose.msrb.mxu2 %v277_v20  ;;  %572 = vmatpush.xpose.msrb.mxu3 %v278_v21  ;;  %v345_v20 = vld [vmem:[%s1108_s28 + $0x570] sm:$0xff]  ;;  %v346_v21 = vld [vmem:[%s1108_s28 + $0x578] sm:$0xff] }
  0x7f   : > { %512 = vmatpush.xpose.msrb.mxu0 %v275_v22  ;;  %532 = vmatpush.xpose.msrb.mxu1 %v276_v23  ;;  %v343_v22 = vld [vmem:[%s1108_s28 + $0x560] sm:$0xff]  ;;  %v344_v23 = vld [vmem:[%s1108_s28 + $0x568] sm:$0xff] }
  0x82   : > { %553 = vmatpush.xpose.msrb.mxu2 %v273_v24  ;;  %573 = vmatpush.xpose.msrb.mxu3 %v274_v25  ;;  %v341_v24 = vld [vmem:[%s1108_s28 + $0x550] sm:$0xff]  ;;  %v342_v25 = vld [vmem:[%s1108_s28 + $0x558] sm:$0xff] }
  0x83   : > { %513 = vmatpush.xpose.msrb.mxu0 %v271_v26  ;;  %533 = vmatpush.xpose.msrb.mxu1 %v272_v27  ;;  %v339_v26 = vld [vmem:[%s1108_s28 + $0x540] sm:$0xff]  ;;  %v340_v27 = vld [vmem:[%s1108_s28 + $0x548] sm:$0xff] }
  0x86   : > { %554 = vmatpush.xpose.msrb.mxu2 %v269_v28  ;;  %574 = vmatpush.xpose.msrb.mxu3 %v270_v29  ;;  %v337_v28 = vld [vmem:[%s1108_s28 + $0x530] sm:$0xff]  ;;  %v338_v29 = vld [vmem:[%s1108_s28 + $0x538] sm:$0xff] }
  0x87   : > { %514 = vmatpush.xpose.msrb.mxu0 %v267_v30  ;;  %534 = vmatpush.xpose.msrb.mxu1 %v268_v31  ;;  %v335_v30 = vld [vmem:[%s1108_s28 + $0x520] sm:$0xff]  ;;  %v336_v31 = vld [vmem:[%s1108_s28 + $0x528] sm:$0xff] }
  0x8a   : > { %555 = vmatpush.xpose.msrb.mxu2 %v265_v33  ;;  %575 = vmatpush.xpose.msrb.mxu3 %v266_v34  ;;  %v333_v33 = vld [vmem:[%s1108_s28 + $0x510] sm:$0xff]  ;;  %v334_v34 = vld [vmem:[%s1108_s28 + $0x518] sm:$0xff] }
  0x8b   : > { %515 = vmatpush.xpose.msrb.mxu0 %v263_v37  ;;  %535 = vmatpush.xpose.msrb.mxu1 %v264_v38  ;;  %v331_v37 = vld [vmem:[%s1108_s28 + $0x500] sm:$0xff]  ;;  %v332_v38 = vld [vmem:[%s1108_s28 + $0x508] sm:$0xff] }
  0x8e   : > { %556 = vmatpush.xpose.msrb.mxu2 %v261_v40  ;;  %576 = vmatpush.xpose.msrb.mxu3 %v262_v41  ;;  %v329_v40 = vld [vmem:[%s1108_s28 + $0x4f0] sm:$0xff]  ;;  %v330_v41 = vld [vmem:[%s1108_s28 + $0x4f8] sm:$0xff] }
  0x8f   : > { %516 = vmatpush.xpose.msrb.mxu0 %v259_v42  ;;  %536 = vmatpush.xpose.msrb.mxu1 %v260_v43  ;;  %v327_v42 = vld [vmem:[%s1108_s28 + $0x4e0] sm:$0xff]  ;;  %v328_v43 = vld [vmem:[%s1108_s28 + $0x4e8] sm:$0xff] }
  0x92   : > { %557 = vmatpush.xpose.msrb.mxu2 %v257_v44  ;;  %577 = vmatpush.xpose.msrb.mxu3 %v258_v45  ;;  %v325_v44 = vld [vmem:[%s1108_s28 + $0x4d0] sm:$0xff]  ;;  %v326_v45 = vld [vmem:[%s1108_s28 + $0x4d8] sm:$0xff] }
  0x93   : > { %517 = vmatpush.xpose.msrb.mxu0 %v255_v46  ;;  %537 = vmatpush.xpose.msrb.mxu1 %v256_v47  ;;  %v323_v46 = vld [vmem:[%s1108_s28 + $0x4c0] sm:$0xff]  ;;  %v324_v47 = vld [vmem:[%s1108_s28 + $0x4c8] sm:$0xff] }
  0x96   : > { %558 = vmatpush.xpose.msrb.mxu2 %v253_v48  ;;  %578 = vmatpush.xpose.msrb.mxu3 %v254_v49  ;;  %v321_v48 = vld [vmem:[%s1108_s28 + $0x4b0] sm:$0xff]  ;;  %v322_v49 = vld [vmem:[%s1108_s28 + $0x4b8] sm:$0xff] }
  0x97   : > { %518 = vmatpush.xpose.msrb.mxu0 %v251_v50  ;;  %538 = vmatpush.xpose.msrb.mxu1 %v252_v51  ;;  %v319_v50 = vld [vmem:[%s1108_s28 + $0x4a0] sm:$0xff]  ;;  %v320_v51 = vld [vmem:[%s1108_s28 + $0x4a8] sm:$0xff] }
  0x9a   : > { %559 = vmatpush.xpose.msrb.mxu2 %v249_v52  ;;  %579 = vmatpush.xpose.msrb.mxu3 %v250_v53  ;;  %v317_v52 = vld [vmem:[%s1108_s28 + $0x490] sm:$0xff]  ;;  %v318_v53 = vld [vmem:[%s1108_s28 + $0x498] sm:$0xff] }
  0x9b   : > { %519 = vmatpush.xpose.msrb.mxu0 %v247_v54  ;;  %539 = vmatpush.xpose.msrb.mxu1 %v248_v55  ;;  %v315_v54 = vld [vmem:[%s1108_s28 + $0x480] sm:$0xff]  ;;  %v316_v55 = vld [vmem:[%s1108_s28 + $0x488] sm:$0xff] }
  0x9e   : > { %560 = vmatpush.xpose.msrb.mxu2 %v245_v56  ;;  %580 = vmatpush.xpose.msrb.mxu3 %v246_v57  ;;  %v313_v56 = vld [vmem:[%s1108_s28 + $0x470] sm:$0xff]  ;;  %v314_v57 = vld [vmem:[%s1108_s28 + $0x478] sm:$0xff] }
  0x9f   : > { %520 = vmatpush.xpose.msrb.mxu0 %v243_v58  ;;  %540 = vmatpush.xpose.msrb.mxu1 %v244_v59  ;;  %v311_v58 = vld [vmem:[%s1108_s28 + $0x460] sm:$0xff]  ;;  %v312_v59 = vld [vmem:[%s1108_s28 + $0x468] sm:$0xff] }
  0xa2   : > { %561 = vmatpush.xpose.msrb.mxu2 %v241_v60  ;;  %581 = vmatpush.xpose.msrb.mxu3 %v242_v61  ;;  %v309_v60 = vld [vmem:[%s1108_s28 + $0x450] sm:$0xff]  ;;  %v310_v61 = vld [vmem:[%s1108_s28 + $0x458] sm:$0xff] }
  0xa3   : > { %521 = vmatpush.xpose.msrb.mxu0 %v239_v62  ;;  %541 = vmatpush.xpose.msrb.mxu1 %v240_v63  ;;  %v307_v62 = vld [vmem:[%s1108_s28 + $0x440] sm:$0xff]  ;;  %v308_v63 = vld [vmem:[%s1108_s28 + $0x448] sm:$0xff] }
  0xa6   : > { %562 = vmatpush.xpose.msrb.mxu2 %v237_v0  ;;  %582 = vmatpush.xpose.msrb.mxu3 %v238_v1  ;;  %v305_v0 = vld [vmem:[%s1108_s28 + $0x430] sm:$0xff]  ;;  %v306_v1 = vld [vmem:[%s1108_s28 + $0x438] sm:$0xff] }
  0xa7   : > { %522 = vmatpush.xpose.msrb.mxu0 %v235_v4  ;;  %542 = vmatpush.xpose.msrb.mxu1 %v236_v5  ;;  %v301_v4 = vld [vmem:[%s1108_s28 + $0x410] sm:$0xff]  ;;  %v302_v5 = vld [vmem:[%s1108_s28 + $0x418] sm:$0xff] }
  0xa9   : > { %563 = vmatmul.f32.vlgmr.msrb.gmra.mxu2 %v1213_v32  ;;  %583 = vmatmul.f32.vlgmr.msrb.gmra.mxu3 %v1221_v35 }
  0xaa   : > { %627 = vmatpush.xpose.msra.mxu2 %v361_v2  ;;  %647 = vmatpush.xpose.msra.mxu3 %v362_v3  ;;  %v303_v2 = vld [vmem:[%s1108_s28 + $0x420] sm:$0xff]  ;;  %v304_v3 = vld [vmem:[%s1108_s28 + $0x428] sm:$0xff] }
  0xab   : > { %587 = vmatpush.xpose.msra.mxu0 %v359_v6  ;;  %607 = vmatpush.xpose.msra.mxu1 %v360_v7  ;;  %v425_v6 = vld [vmem:[%s1108_s28 + $0x7f0] sm:$0xff]  ;;  %v426_v7 = vld [vmem:[%s1108_s28 + $0x7f8] sm:$0xff] }
  0xac   : > { %523 = vmatmul.f32.vlgmr.msrb.gmra.mxu0 %v1226_v36  ;;  %543 = vmatmul.f32.vlgmr.msrb.gmra.mxu1 %v1235_v39 }
  0xae   : > { %628 = vmatpush.xpose.msra.mxu2 %v357_v8  ;;  %648 = vmatpush.xpose.msra.mxu3 %v358_v9  ;;  %v299_v8 = vld [vmem:[%s1108_s28 + $0x400] sm:$0xff]  ;;  %v300_v9 = vld [vmem:[%s1108_s28 + $0x408] sm:$0xff] }
  0xaf   : > { %588 = vmatpush.xpose.msra.mxu0 %v355_v10  ;;  %608 = vmatpush.xpose.msra.mxu1 %v356_v11  ;;  %v423_v10 = vld [vmem:[%s1108_s28 + $0x7e0] sm:$0xff]  ;;  %v424_v11 = vld [vmem:[%s1108_s28 + $0x7e8] sm:$0xff] }
  0xb2   : > { %629 = vmatpush.xpose.msra.mxu2 %v353_v12  ;;  %649 = vmatpush.xpose.msra.mxu3 %v354_v13  ;;  %v421_v12 = vld [vmem:[%s1108_s28 + $0x7d0] sm:$0xff]  ;;  %v422_v13 = vld [vmem:[%s1108_s28 + $0x7d8] sm:$0xff] }
  0xb3   : > { %589 = vmatpush.xpose.msra.mxu0 %v351_v14  ;;  %609 = vmatpush.xpose.msra.mxu1 %v352_v15  ;;  %v419_v14 = vld [vmem:[%s1108_s28 + $0x7c0] sm:$0xff]  ;;  %v420_v15 = vld [vmem:[%s1108_s28 + $0x7c8] sm:$0xff] }
  0xb6   : > { %630 = vmatpush.xpose.msra.mxu2 %v349_v16  ;;  %650 = vmatpush.xpose.msra.mxu3 %v350_v17  ;;  %v417_v16 = vld [vmem:[%s1108_s28 + $0x7b0] sm:$0xff]  ;;  %v418_v17 = vld [vmem:[%s1108_s28 + $0x7b8] sm:$0xff] }
  0xb7   : > { %590 = vmatpush.xpose.msra.mxu0 %v347_v18  ;;  %610 = vmatpush.xpose.msra.mxu1 %v348_v19  ;;  %v415_v18 = vld [vmem:[%s1108_s28 + $0x7a0] sm:$0xff]  ;;  %v416_v19 = vld [vmem:[%s1108_s28 + $0x7a8] sm:$0xff] }
  0xba   : > { %631 = vmatpush.xpose.msra.mxu2 %v345_v20  ;;  %651 = vmatpush.xpose.msra.mxu3 %v346_v21  ;;  %v413_v20 = vld [vmem:[%s1108_s28 + $0x790] sm:$0xff]  ;;  %v414_v21 = vld [vmem:[%s1108_s28 + $0x798] sm:$0xff] }
  0xbb   : > { %591 = vmatpush.xpose.msra.mxu0 %v343_v22  ;;  %611 = vmatpush.xpose.msra.mxu1 %v344_v23  ;;  %v411_v22 = vld [vmem:[%s1108_s28 + $0x780] sm:$0xff]  ;;  %v412_v23 = vld [vmem:[%s1108_s28 + $0x788] sm:$0xff] }
  0xbe   : > { %632 = vmatpush.xpose.msra.mxu2 %v341_v24  ;;  %652 = vmatpush.xpose.msra.mxu3 %v342_v25  ;;  %v409_v24 = vld [vmem:[%s1108_s28 + $0x770] sm:$0xff]  ;;  %v410_v25 = vld [vmem:[%s1108_s28 + $0x778] sm:$0xff] }
  0xbf   : > { %592 = vmatpush.xpose.msra.mxu0 %v339_v26  ;;  %612 = vmatpush.xpose.msra.mxu1 %v340_v27  ;;  %v407_v26 = vld [vmem:[%s1108_s28 + $0x760] sm:$0xff]  ;;  %v408_v27 = vld [vmem:[%s1108_s28 + $0x768] sm:$0xff] }
  0xc2   : > { %633 = vmatpush.xpose.msra.mxu2 %v337_v28  ;;  %653 = vmatpush.xpose.msra.mxu3 %v338_v29  ;;  %v405_v28 = vld [vmem:[%s1108_s28 + $0x750] sm:$0xff]  ;;  %v406_v29 = vld [vmem:[%s1108_s28 + $0x758] sm:$0xff] }
  0xc3   : > { %593 = vmatpush.xpose.msra.mxu0 %v335_v30  ;;  %613 = vmatpush.xpose.msra.mxu1 %v336_v31  ;;  %v403_v30 = vld [vmem:[%s1108_s28 + $0x740] sm:$0xff]  ;;  %v404_v31 = vld [vmem:[%s1108_s28 + $0x748] sm:$0xff] }
  0xc6   : > { %634 = vmatpush.xpose.msra.mxu2 %v333_v33  ;;  %654 = vmatpush.xpose.msra.mxu3 %v334_v34  ;;  %v401_v33 = vld [vmem:[%s1108_s28 + $0x730] sm:$0xff]  ;;  %v402_v34 = vld [vmem:[%s1108_s28 + $0x738] sm:$0xff] }
  0xc7   : > { %594 = vmatpush.xpose.msra.mxu0 %v331_v37  ;;  %614 = vmatpush.xpose.msra.mxu1 %v332_v38  ;;  %v399_v37 = vld [vmem:[%s1108_s28 + $0x720] sm:$0xff]  ;;  %v400_v38 = vld [vmem:[%s1108_s28 + $0x728] sm:$0xff] }
  0xca   : > { %635 = vmatpush.xpose.msra.mxu2 %v329_v40  ;;  %655 = vmatpush.xpose.msra.mxu3 %v330_v41  ;;  %v397_v40 = vld [vmem:[%s1108_s28 + $0x710] sm:$0xff]  ;;  %v398_v41 = vld [vmem:[%s1108_s28 + $0x718] sm:$0xff] }
  0xcb   : > { %595 = vmatpush.xpose.msra.mxu0 %v327_v42  ;;  %615 = vmatpush.xpose.msra.mxu1 %v328_v43  ;;  %v395_v42 = vld [vmem:[%s1108_s28 + $0x700] sm:$0xff]  ;;  %v396_v43 = vld [vmem:[%s1108_s28 + $0x708] sm:$0xff] }
  0xce   : > { %636 = vmatpush.xpose.msra.mxu2 %v325_v44  ;;  %656 = vmatpush.xpose.msra.mxu3 %v326_v45  ;;  %v393_v44 = vld [vmem:[%s1108_s28 + $0x6f0] sm:$0xff]  ;;  %v394_v45 = vld [vmem:[%s1108_s28 + $0x6f8] sm:$0xff] }
  0xcf   : > { %596 = vmatpush.xpose.msra.mxu0 %v323_v46  ;;  %616 = vmatpush.xpose.msra.mxu1 %v324_v47  ;;  %v391_v46 = vld [vmem:[%s1108_s28 + $0x6e0] sm:$0xff]  ;;  %v392_v47 = vld [vmem:[%s1108_s28 + $0x6e8] sm:$0xff] }
  0xd2   : > { %637 = vmatpush.xpose.msra.mxu2 %v321_v48  ;;  %657 = vmatpush.xpose.msra.mxu3 %v322_v49  ;;  %v389_v48 = vld [vmem:[%s1108_s28 + $0x6d0] sm:$0xff]  ;;  %v390_v49 = vld [vmem:[%s1108_s28 + $0x6d8] sm:$0xff] }
  0xd3   : > { %597 = vmatpush.xpose.msra.mxu0 %v319_v50  ;;  %617 = vmatpush.xpose.msra.mxu1 %v320_v51  ;;  %v387_v51 = vld [vmem:[%s1108_s28 + $0x6c0] sm:$0xff] }
  0xd6   : > { %638 = vmatpush.xpose.msra.mxu2 %v317_v52  ;;  %658 = vmatpush.xpose.msra.mxu3 %v318_v53  ;;  %v388_v52 = vld [vmem:[%s1108_s28 + $0x6c8] sm:$0xff] }
  0xd7   : > { %598 = vmatpush.xpose.msra.mxu0 %v315_v54  ;;  %618 = vmatpush.xpose.msra.mxu1 %v316_v55  ;;  %v385_v54 = vld [vmem:[%s1108_s28 + $0x6b0] sm:$0xff]  ;;  %v386_v55 = vld [vmem:[%s1108_s28 + $0x6b8] sm:$0xff] }
  0xda   : > { %639 = vmatpush.xpose.msra.mxu2 %v313_v56  ;;  %659 = vmatpush.xpose.msra.mxu3 %v314_v57 }
  0xdb   : > { %599 = vmatpush.xpose.msra.mxu0 %v311_v58  ;;  %619 = vmatpush.xpose.msra.mxu1 %v312_v59  ;;  %v383_v58 = vld [vmem:[%s1108_s28 + $0x6a0] sm:$0xff]  ;;  %v384_v59 = vld [vmem:[%s1108_s28 + $0x6a8] sm:$0xff] }
  0xde   : > { %640 = vmatpush.xpose.msra.mxu2 %v309_v60  ;;  %660 = vmatpush.xpose.msra.mxu3 %v310_v61 }
  0xdf   : > { %600 = vmatpush.xpose.msra.mxu0 %v307_v62  ;;  %620 = vmatpush.xpose.msra.mxu1 %v308_v63  ;;  %v381_v62 = vld [vmem:[%s1108_s28 + $0x690] sm:$0xff]  ;;  %v382_v63 = vld [vmem:[%s1108_s28 + $0x698] sm:$0xff] }
  0xe2   : > { %641 = vmatpush.xpose.msra.mxu2 %v305_v0  ;;  %661 = vmatpush.xpose.msra.mxu3 %v306_v1  ;;  %v379_v1 = vld [vmem:[%s1108_s28 + $0x680] sm:$0xff] }
  0xe3   : > { %601 = vmatpush.xpose.msra.mxu0 %v303_v2  ;;  %621 = vmatpush.xpose.msra.mxu1 %v304_v3  ;;  %v380_v2 = vld [vmem:[%s1108_s28 + $0x688] sm:$0xff]  ;;  %v377_v3 = vld [vmem:[%s1108_s28 + $0x670] sm:$0xff] }
  0xe6   : > { %642 = vmatpush.xpose.msra.mxu2 %v301_v4  ;;  %662 = vmatpush.xpose.msra.mxu3 %v302_v5  ;;  %v378_v4 = vld [vmem:[%s1108_s28 + $0x678] sm:$0xff]  ;;  %v375_v5 = vld [vmem:[%s1108_s28 + $0x660] sm:$0xff] }
  0xe7   : > { %602 = vmatpush.xpose.msra.mxu0 %v299_v8  ;;  %622 = vmatpush.xpose.msra.mxu1 %v300_v9  ;;  %v374_v8 = vld [vmem:[%s1108_s28 + $0x658] sm:$0xff]  ;;  %v371_v9 = vld [vmem:[%s1108_s28 + $0x640] sm:$0xff] }
  0xe9   : > { %643 = vmatmul.f32.vlgmr.msra.gmra.mxu2 %v1213_v32  ;;  %663 = vmatmul.f32.vlgmr.msra.gmra.mxu3 %v1221_v35  ;;  %v444_v50 = vpop.f32.mrf.mxu0  ;;  %v464_v53 = vpop.f32.mrf.mxu1 }
  0xea   : > { %707 = vmatpush.xpose.msrb.mxu2 %v425_v6  ;;  %727 = vmatpush.xpose.msrb.mxu3 %v426_v7  ;;  %v465_v56 = vadd.f32 %v464_v53, %v444_v50  ;;  %v376_v6 = vld [vmem:[%s1108_s28 + $0x668] sm:$0xff]  ;;  %v373_v7 = vld [vmem:[%s1108_s28 + $0x650] sm:$0xff] }
  0xeb   : > { %667 = vmatpush.xpose.msrb.mxu0 %v423_v10  ;;  %687 = vmatpush.xpose.msrb.mxu1 %v424_v11  ;;  %v372_v10 = vld [vmem:[%s1108_s28 + $0x648] sm:$0xff]  ;;  %v369_v11 = vld [vmem:[%s1108_s28 + $0x630] sm:$0xff] }
  0xec   : > { %603 = vmatmul.f32.vlgmr.msra.gmra.mxu0 %v1226_v36  ;;  %623 = vmatmul.f32.vlgmr.msra.gmra.mxu1 %v1235_v39  ;;  %v484_v57 = vpop.f32.mrf.mxu2  ;;  %v504_v61 = vpop.f32.mrf.mxu3 }
  0xed   : > { %v485_v60 = vadd.f32 %v484_v57, %v465_v56 }
  0xee   : > { %708 = vmatpush.xpose.msrb.mxu2 %v421_v12  ;;  %728 = vmatpush.xpose.msrb.mxu3 %v422_v13  ;;  %v370_v12 = vld [vmem:[%s1108_s28 + $0x638] sm:$0xff]  ;;  %v367_v13 = vld [vmem:[%s1108_s28 + $0x620] sm:$0xff] }
  0xef   : > { %668 = vmatpush.xpose.msrb.mxu0 %v419_v14  ;;  %688 = vmatpush.xpose.msrb.mxu1 %v420_v15  ;;  %v505_v0 = vadd.f32 %v504_v61, %v485_v60  ;;  %v368_v14 = vld [vmem:[%s1108_s28 + $0x628] sm:$0xff]  ;;  %v365_v15 = vld [vmem:[%s1108_s28 + $0x610] sm:$0xff] }
  0xf1   : > { %747 = vst [vmem:[%s1387_s14] sm:$0xff] %v505_v0 }
  0xf2   : > { %709 = vmatpush.xpose.msrb.mxu2 %v417_v16  ;;  %729 = vmatpush.xpose.msrb.mxu3 %v418_v17  ;;  %v366_v16 = vld [vmem:[%s1108_s28 + $0x618] sm:$0xff]  ;;  %v363_v17 = vld [vmem:[%s1108_s28 + $0x600] sm:$0xff] }
  0xf3   : > { %669 = vmatpush.xpose.msrb.mxu0 %v415_v18  ;;  %689 = vmatpush.xpose.msrb.mxu1 %v416_v19  ;;  %v364_v18 = vld [vmem:[%s1108_s28 + $0x608] sm:$0xff]  ;;  %s948_s28 = sshra.s32 %s768_s26, 4  ;;  %s949_s28 = int_to_ptr.hbm [resolvable:$true] %s948_s28 }
  0xf4   : > { %s950_s13 = scalar_lea.hbm %s949_s28, 32  ;;  %p955_p0 = scmp.lt.s32.totalorder %s949_s28, %s1448_s2 }
  0xf5   : > { %p951_p6 = scmp.ne.s32.totalorder %s949_s28, %s950_s13  ;;  %p956_p2 = scmp.lt.s32.totalorder %s954_s30, %s950_s13 }
  0xf6   : > { %710 = vmatpush.xpose.msrb.mxu2 %v413_v20  ;;  %730 = vmatpush.xpose.msrb.mxu3 %v414_v21 }
  0xf7   : > { %670 = vmatpush.xpose.msrb.mxu0 %v411_v22  ;;  %690 = vmatpush.xpose.msrb.mxu1 %v412_v23  ;;  %p952_p12 = pnand %p951_p6, %p1068_p10  ;;  %p957_p3 = por %p956_p2, %p955_p0 }
  0xf9   : > { %p953_p13 = pneg %p952_p12 }
  0xfa   : > { %711 = vmatpush.xpose.msrb.mxu2 %v409_v24  ;;  %731 = vmatpush.xpose.msrb.mxu3 %v410_v25 }
  0xfb   : > { %671 = vmatpush.xpose.msrb.mxu0 %v407_v26  ;;  %691 = vmatpush.xpose.msrb.mxu1 %v408_v27  ;;  %p958_p4 = pnand %p957_p3, %p953_p13 }
  0xfe   : > { %712 = vmatpush.xpose.msrb.mxu2 %v405_v28  ;;  %732 = vmatpush.xpose.msrb.mxu3 %v406_v29 }
  0xff   : > { %672 = vmatpush.xpose.msrb.mxu0 %v403_v30  ;;  %692 = vmatpush.xpose.msrb.mxu1 %v404_v31 }
 0x102   : > { %713 = vmatpush.xpose.msrb.mxu2 %v401_v33  ;;  %733 = vmatpush.xpose.msrb.mxu3 %v402_v34 }
 0x103   : > { %673 = vmatpush.xpose.msrb.mxu0 %v399_v37  ;;  %693 = vmatpush.xpose.msrb.mxu1 %v400_v38 }
 0x106   : > { %714 = vmatpush.xpose.msrb.mxu2 %v397_v40  ;;  %734 = vmatpush.xpose.msrb.mxu3 %v398_v41 }
 0x107   : > { %674 = vmatpush.xpose.msrb.mxu0 %v395_v42  ;;  %694 = vmatpush.xpose.msrb.mxu1 %v396_v43 }
 0x10a   : > { %715 = vmatpush.xpose.msrb.mxu2 %v393_v44  ;;  %735 = vmatpush.xpose.msrb.mxu3 %v394_v45 }
 0x10b   : > { %675 = vmatpush.xpose.msrb.mxu0 %v391_v46  ;;  %695 = vmatpush.xpose.msrb.mxu1 %v392_v47 }
 0x10e   : > { %716 = vmatpush.xpose.msrb.mxu2 %v389_v48  ;;  %736 = vmatpush.xpose.msrb.mxu3 %v390_v49 }
 0x10f   : > { %676 = vmatpush.xpose.msrb.mxu0 %v387_v51  ;;  %696 = vmatpush.xpose.msrb.mxu1 %v388_v52 }
 0x112   : > { %717 = vmatpush.xpose.msrb.mxu2 %v385_v54  ;;  %737 = vmatpush.xpose.msrb.mxu3 %v386_v55 }
 0x113   : > { %677 = vmatpush.xpose.msrb.mxu0 %v383_v58  ;;  %697 = vmatpush.xpose.msrb.mxu1 %v384_v59 }
 0x116   : > { %718 = vmatpush.xpose.msrb.mxu2 %v381_v62  ;;  %738 = vmatpush.xpose.msrb.mxu3 %v382_v63 }
 0x117   : > { %678 = vmatpush.xpose.msrb.mxu0 %v379_v1  ;;  %698 = vmatpush.xpose.msrb.mxu1 %v380_v2 }
 0x11a   : > { %719 = vmatpush.xpose.msrb.mxu2 %v377_v3  ;;  %739 = vmatpush.xpose.msrb.mxu3 %v378_v4 }
 0x11b   : > { %679 = vmatpush.xpose.msrb.mxu0 %v375_v5  ;;  %699 = vmatpush.xpose.msrb.mxu1 %v376_v6 }
 0x11e   : > { %720 = vmatpush.xpose.msrb.mxu2 %v373_v7  ;;  %740 = vmatpush.xpose.msrb.mxu3 %v374_v8 }
 0x11f   : > { %680 = vmatpush.xpose.msrb.mxu0 %v371_v9  ;;  %700 = vmatpush.xpose.msrb.mxu1 %v372_v10 }
 0x122   : > { %721 = vmatpush.xpose.msrb.mxu2 %v369_v11  ;;  %741 = vmatpush.xpose.msrb.mxu3 %v370_v12 }
 0x123   : > { %681 = vmatpush.xpose.msrb.mxu0 %v367_v13  ;;  %701 = vmatpush.xpose.msrb.mxu1 %v368_v14 }
 0x126   : > { %722 = vmatpush.xpose.msrb.mxu2 %v365_v15  ;;  %742 = vmatpush.xpose.msrb.mxu3 %v366_v16 }
 0x127   : > { %682 = vmatpush.xpose.msrb.mxu0 %v363_v17  ;;  %702 = vmatpush.xpose.msrb.mxu1 %v364_v18 }
 0x129   : > { %723 = vmatmul.f32.vlgmr.msrb.gmra.mxu2 %v1213_v32  ;;  %743 = vmatmul.f32.vlgmr.msrb.gmra.mxu3 %v1221_v35  ;;  %v524_v19 = vpop.f32.mrf.mxu0  ;;  %v544_v20 = vpop.f32.mrf.mxu1 }
 0x12a   : > { %683 = vmatmul.f32.vlgmr.msrb.gmra.mxu0 %v1226_v36  ;;  %703 = vmatmul.f32.vlgmr.msrb.gmra.mxu1 %v1235_v39  ;;  %v545_v21 = vadd.f32 %v544_v20, %v524_v19 }
 0x12c   : > { %v564_v22 = vpop.f32.mrf.mxu2  ;;  %v584_v23 = vpop.f32.mrf.mxu3 }
 0x12d   : > { %v565_v24 = vadd.f32 %v564_v22, %v545_v21 }
 0x12f   : > { %v585_v25 = vadd.f32 %v584_v23, %v565_v24 }
 0x131   : > { %748 = vst [vmem:[%s1387_s14 + $0x8] sm:$0xff] %v585_v25 }
 0x169   : > { %v604_v26 = vpop.f32.mrf.mxu0  ;;  %v624_v27 = vpop.f32.mrf.mxu1 }
 0x16a   : > { %v625_v32 = vadd.f32 %v624_v27, %v604_v26 }
 0x16c   : > { %v644_v28 = vpop.f32.mrf.mxu2  ;;  %v664_v35 = vpop.f32.mrf.mxu3 }
 0x16d   : > { %v645_v29 = vadd.f32 %v644_v28, %v625_v32 }
 0x16f   : > { %v665_v36 = vadd.f32 %v664_v35, %v645_v29 }
 0x171   : > { %749 = vst [vmem:[%s1387_s14 + $0x10] sm:$0xff] %v665_v36 }
 0x1a7   : > { %v684_v39 = vpop.f32.mrf.mxu0  ;;  %v704_v30 = vpop.f32.mrf.mxu1 }
 0x1a8   : > { %v705_v31 = vadd.f32 %v704_v30, %v684_v39 }
 0x1ac   : > { %v724_v33 = vpop.f32.mrf.mxu2  ;;  %v744_v34 = vpop.f32.mrf.mxu3 }
 0x1ad   : > { %v725_v37 = vadd.f32 %v724_v33, %v705_v31 }
 0x1af   : > { %v745_v38 = vadd.f32 %v744_v34, %v725_v37 }
 0x1b1   : > { %750 = vst [vmem:[%s1387_s14 + $0x18] sm:$0xff] %v745_v38 }
 0x1b2   : > { %961 = shalt.err (!%p958_p4)
}
 0x1b3   : > { %858 = dma.vmem_to_hbm [thread:$0]  (%p1068_p10), %s766_s24, 512, %s768_s26, %s752_s27  }
 0x1b4 PF: > { %p869_p5 = scmp.ge.s32.totalorder %s1000_s12, 2  ;;  %s779_s25 = sand.u32 1, %s988_s9  }
 0x1b5   : > { %s780_s5 = scalar_lea.sflag [#allocation4], %s779_s25 }
 0x1b6   : > { %p865_p7 = pnand %p869_p5, %p1072_p11 }
 0x1b8   : > { %p866_p8 = pneg %p865_p7 }
 0x1ba   : > { %983 = dma.done.wait (%p866_p8), %s780_s5, 512  }
 0x1bb   : > { %985 = vsyncadd (%p866_p8), %s780_s5, 4294966784  ;;  %p15_p9 = scmp.ge.s32.totalorder %s1044_s15, 6   ;;  %s1454_s9 = smov %s992_s10 }
 0x1bc   : > { %s1455_s10 = smov %s996_s11  ;;  %s1456_s11 = smov %s1056_s18 }
 0x1bd   : > { %s1457_s12 = smov %s1044_s15  ;;  %17 = sbr.rel (!%p15_p9) target bundleno = 5 (0x5), region = 73 }
 0x1c2   :  { %786 = vsyncpa [#allocation3], 1 }
 0x1c3   :  { %788 = vsyncpa [#allocation3 + $0x1], 1 }
 0x1c4   :  { %789 = vsyncpa [#allocation4], 1 }
 0x1c5   :  { %791 = vsyncpa [#allocation4 + $0x1], 1 }

</bundles_post_ra>
